<compile_context>
chip_gen: v7x
topology: tpu7x:2x2x1
jax: 0.10.0
libtpu: 0.0.40
codegen_flags: <defaults>
</compile_context>

<pallas_src>
import jax
import jax.numpy as jnp
from jax.experimental import pallas as pl
from jax.experimental.pallas import tpu as pltpu


_VMEM_BLOCK_BUDGET = 16 * 1024 * 1024   # bytes for (in + out) blocks, x2 double-buffer
_VMEM_LIMIT_BYTES = 32 * 1024 * 1024    # scoped VMEM limit (safe on v5e/v6e/v7x)


def _viewcut_copy_kernel(x_ref, o_ref):
    # Input block already excludes the dropped row's elements: straight copy.
    o_ref[...] = x_ref[...]


def _viewcut_slice_kernel(x_ref, o_ref):
    # x_ref: (TB, A*I), o_ref: (TB, (A-1)*I) — keep the lane prefix.
    cut = o_ref.shape[1]
    o_ref[...] = x_ref[:, :cut]


def _sublane_tile(itemsize: int) -> int:
    # native sublane tile: 8 for 4-byte, 16 for 2-byte, 32 for 1-byte dtypes
    return 8 * max(1, 4 // itemsize)


def _pick_batch_tile(B: int, A: int, I: int, itemsize: int) -> int:
    # VMEM bytes per batch row: input (A*I) + output ((A-1)*I) blocks,
    # each double-buffered by the pipeline.
    per_row = (A * I + (A - 1) * I) * itemsize * 2
    tb = max(1, _VMEM_BLOCK_BUDGET // per_row)
    if tb >= B:
        return B
    sub = _sublane_tile(itemsize)
    return max(sub, (tb // sub) * sub)


def view_cut(x: jax.Array, *, max_batch_tile: int | None = None) -> jax.Array:
    """Pallas implementation of x[:, :-1, :] for a (B, A, I) array."""
    B, A, I = x.shape
    assert A >= 2, "need at least 2 rows along axis 1 to cut one"

    itemsize = jnp.dtype(x.dtype).itemsize
    full = A * I
    cut = (A - 1) * I

    # Lane-dense 2-D view of input / output.
    x2 = x.reshape(B, full)

    TB = _pick_batch_tile(B, A, I, itemsize)
    if max_batch_tile is not None:
        TB = min(TB, max_batch_tile)
        if TB < B:
            sub = _sublane_tile(itemsize)
            TB = max(sub, (TB // sub) * sub)
    TB = min(TB, B) if TB >= B else TB
    num_tiles = pl.cdiv(B, TB)

    # If the kept prefix is lane-tile aligned, never DMA the dropped row.
    reduced_read = (cut % 128 == 0)
    if reduced_read:
        in_spec = pl.BlockSpec((TB, cut), lambda b: (b, 0))
        kernel = _viewcut_copy_kernel
    else:
        in_spec = pl.BlockSpec((TB, full), lambda b: (b, 0))
        kernel = _viewcut_slice_kernel
    out_spec = pl.BlockSpec((TB, cut), lambda b: (b, 0))

    bytes_read = B * (cut if reduced_read else full) * itemsize
    bytes_written = B * cut * itemsize
    cost = pl.CostEstimate(
        flops=0,
        transcendentals=0,
        bytes_accessed=bytes_read + bytes_written,
    )

    out2 = pl.pallas_call(
        kernel,
        out_shape=jax.ShapeDtypeStruct((B, cut), x.dtype),
        grid_spec=pltpu.PrefetchScalarGridSpec(
            num_scalar_prefetch=0,
            grid=(num_tiles,),
            in_specs=[in_spec],
            out_specs=out_spec,
        ),
        compiler_params=pltpu.CompilerParams(
            dimension_semantics=("parallel",),
            vmem_limit_bytes=_VMEM_LIMIT_BYTES,
        ),
        cost_estimate=cost,
    )(x2)

    return out2.reshape(B, A - 1, I)


if __name__ == "__main__":
    key = jax.random.PRNGKey(0)

    # Primary small test consistent with regretnet: (batch, agents+1, items).
    B, A, I = 2, 5, 16
    x = jax.random.normal(key, (B, A, I), dtype=jnp.float32)
    y = jax.block_until_ready(view_cut(x))
    assert y.shape == (B, A - 1, I)
    assert y.dtype == x.dtype
    assert jnp.array_equal(y, x[:, :-1, :])

    # Multi-tile grid with a ragged last tile + reduced-read (no-dropped-row
    # DMA) path: (A-1)*I = 256 is a multiple of 128.
    B2, A2, I2 = 20, 9, 32
    x2 = jax.random.normal(jax.random.PRNGKey(0), (B2, A2, I2), dtype=jnp.float32)
    y2 = jax.block_until_ready(view_cut(x2, max_batch_tile=8))
    assert y2.shape == (B2, A2 - 1, I2)
    assert jnp.array_equal(y2, x2[:, :-1, :])

    print("KERNEL_OK")
</pallas_src>

<mosaic_0001>
module attributes {stable_mosaic.version = 11 : i64} {
  func.func @_viewcut_slice_kernel(%arg0: i32, %arg1: memref<2x80xf32, #tpu.memory_space<vmem>>, %arg2: memref<2x64xf32, #tpu.memory_space<vmem>>) attributes {dimension_semantics = [#tpu.dimension_semantics<parallel>], iteration_bounds = array<i64: 1>, scalar_prefetch = 0 : i64, scratch_operands = 0 : i64, tpu.core_type = #tpu.core_type<tc>, window_params = [{transform_indices = @transform_0, window_bounds = array<i64: 2, 80>}, {transform_indices = @transform_1, window_bounds = array<i64: 2, 64>}]} {
    %c0 = arith.constant 0 : index
    %c0_0 = arith.constant 0 : index
    %0 = vector.load %arg1[%c0, %c0_0] : memref<2x80xf32, #tpu.memory_space<vmem>>, vector<2x64xf32>
    %c0_1 = arith.constant 0 : index
    %c0_2 = arith.constant 0 : index
    %1 = vector.load %arg2[%c0_1, %c0_2] : memref<2x64xf32, #tpu.memory_space<vmem>>, vector<2x64xf32>
    tpu.vector_store %arg2[%c0_1, %c0_2], %0 {strides = array<i32>} : memref<2x64xf32, #tpu.memory_space<vmem>>, vector<2x64xf32>,
    return
  }
  func.func @transform_0(%arg0: i32) -> (i32, i32) {
    %c0_i32 = arith.constant 0 : i32
    %c0_i32_0 = arith.constant 0 : i32
    return %arg0, %c0_i32 : i32, i32
  }
  func.func @transform_1(%arg0: i32) -> (i32, i32) {
    %c0_i32 = arith.constant 0 : i32
    %c0_i32_0 = arith.constant 0 : i32
    return %arg0, %c0_i32 : i32, i32
  }
}

</mosaic_0001>

<bundles_post_ra>
// kernel: tpu_custom_call.1
= control target key start
LH: loop header
LB: loop body
LE: loop exit
PB: predicated region body
PF: predicated region fallthrough
CT: control target
= control target key end

     0   :  { %6 = vsyncpa [#allocation3], 0  ;;  %s125_s0 = inlined_call_operand.hbm [shape: f32[2,80], index: 0, kind: input, shape index: {}]   ;;  %s126_s1 = inlined_call_operand.hbm [shape: f32[2,64], index: 1, kind: output, shape index: {}]  }
   0x1   :  { %7 = vsyncpa [#allocation4], 0  ;;  %s89_s6 = smov [#allocation2]   ;;  %s41_s10 = scalar_lea.hbm %s125_s0, 32 }
   0x2   :  { %s14_s7 = sshll.u32 %s89_s6, 4  ;;  %p42_p0 = scmp.ne.s32.totalorder %s125_s0, %s41_s10  ;;  %s15_s7 = int_to_ptr.vmem [resolvable:$true] %s14_s7 }
   0x3   :  { %p45_p1 = scmp.lt.u32.totalorder %s41_s10, %s125_s0 }
   0x5   :  { %p47_p2 = pnand %p45_p1, %p42_p0 }
   0x7   :  { %50 = shalt.err (!%p47_p2)
}
   0x8   :  { %s51_s15 = scalar_lea.vmem %s15_s7, 32  ;;  %p56_p4 = scmp.lt.s32.totalorder %s15_s7, %s15_s7 }
   0x9   :  { %p52_p3 = scmp.ne.s32.totalorder %s15_s7, %s51_s15  ;;  %p57_p5 = scmp.lt.s32.totalorder %s51_s15, %s51_s15 }
   0xb   :  { %p58_p6 = por %p57_p5, %p56_p4 }
   0xd   :  { %p59_p7 = pnand %p58_p6, %p52_p3 }
   0xf   :  { %62 = shalt.err (!%p59_p7)
}
  0x10   :  { %17 = dma.hbm_to_vmem [thread:$0]  %s125_s0, 32, %s15_s7, [#allocation3]  }
  0x11   :  { %85 = dma.done.wait [#allocation3], 32  }
  0x12   :  { %86 = vsyncadd [#allocation3], 4294967264  ;;  %s90_s18 = smov [#allocation5]   ;;  %vm22_vm0 = vcmask 517120   ;;  %v21_v0 = vld [vmem:[#allocation2] sm:$0x3] }
  0x13   :  { %s30_s19 = sshll.u32 %s90_s18, 4  ;;  %23 = vst.msk [vmem:[#allocation5] sm:$0x3] %vm22_vm0, %v21_v0  ;;  %s31_s19 = int_to_ptr.vmem [resolvable:$true] %s30_s19 }
  0x14   :  { %s63_s20 = scalar_lea.vmem %s31_s19, 32  ;;  %p68_p9 = scmp.lt.s32.totalorder %s31_s19, %s31_s19 }
  0x15   :  { %p64_p8 = scmp.ne.s32.totalorder %s31_s19, %s63_s20  ;;  %p69_p10 = scmp.lt.s32.totalorder %s63_s20, %s63_s20 }
  0x17   :  { %p70_p11 = por %p69_p10, %p68_p9 }
  0x19   :  { %p71_p12 = pnand %p70_p11, %p64_p8 }
  0x1b   :  { %74 = shalt.err (!%p71_p12)
}
  0x1c   :  { %s75_s23 = scalar_lea.hbm %s126_s1, 32 }
  0x1d   :  { %p76_p13 = scmp.ne.s32.totalorder %s126_s1, %s75_s23  ;;  %p79_p0 = scmp.lt.u32.totalorder %s75_s23, %s126_s1 }
  0x1f   :  { %p81_p1 = pnand %p79_p0, %p76_p13 }
  0x21   :  { %84 = shalt.err (!%p81_p1)
}
  0x22   :  { %33 = dma.vmem_to_hbm [thread:$0]  %s31_s19, 32, %s126_s1, [#allocation4]  }
  0x23   :  { %87 = dma.done.wait [#allocation4], 32  }
  0x24   :  { %88 = vsyncadd [#allocation4], 4294967264 }
  0x25   :  { %37 = vsyncpa [#allocation3], 1 }
  0x26   :  { %38 = vsyncpa [#allocation4], 1 }

</bundles_post_ra>
